<compile_context>
chip_gen: v7x
topology: tpu7x:2x2x1
jax: 0.10.0
libtpu: 0.0.40
codegen_flags: <defaults>
</compile_context>

<pallas_src>
import functools

import jax
import jax.numpy as jnp
import numpy as np
from jax.experimental import pallas as pl
from jax.experimental.pallas import tpu as pltpu


def _int_pow(z, g):
    """z**g for a small non-negative integer g via repeated multiply (keeps EUP free)."""
    g = int(g)
    if g == 0:
        return jnp.ones_like(z)
    r = z
    for _ in range(g - 1):
        r = r * z
    return r


def _plan_spatial(hw, *, ts_target=1024):
    """Split the flattened spatial extent into rows of 128 lanes.

    Returns (ts, n_chunks, inner, r_pad) with r_pad = n_chunks * inner * ts,
    so the grid is (N, n_chunks, inner) and each step handles a (TS, 128) slab.
    """
    r = pl.cdiv(hw, 128)  # rows of 128 lanes (lane axis fully dense)
    if r <= ts_target:
        if r >= 16 and r % 16 == 0:
            # two parallel spatial chunks -> both v7x TCs busy even at N == 1
            return r // 2, 2, 1, r
        return r, 1, 1, r  # single block; TS == full extent is always legal
    # large spatial extent: prefer a multiple-of-8 divisor of r near ts_target
    # (no padding copy); otherwise pad the row count up to a multiple of TS.
    ts = (ts_target // 8) * 8
    floor = max(8, ts_target // 2)
    while ts >= floor and r % ts:
        ts -= 8
    if ts < floor or r % ts:
        ts = (ts_target // 8) * 8          # no aligned divisor: pad the tail
    s = pl.cdiv(r, ts)
    n_chunks = 2 if s % 2 == 0 else 1
    return ts, n_chunks, s // n_chunks, s * ts


def _focal_loss_kernel(x_ref, t_ref, out_ref, *, gamma, alpha, num_classes):
    # zero the (1, TS, 128) accumulator on the first visit along the inner axis
    @pl.when(pl.program_id(2) == 0)
    def _():
        out_ref[...] = jnp.zeros_like(out_ref)

    x = x_ref[...].astype(jnp.float32)        # (1, C, TS, 128) dense slabs
    t = t_ref[...].astype(jnp.float32)        # (1, TS, 128)

    # channel max / sum as elementwise VPU ops across the C slabs (no XLU)
    m = x[:, 0]
    for c in range(1, num_classes):
        m = jnp.maximum(m, x[:, c])

    e1 = jnp.exp(x[:, 1] - m)                 # class-1 exp
    rest = jnp.exp(x[:, 0] - m)               # sum of non-class-1 exps
    for c in range(2, num_classes):
        rest = rest + jnp.exp(x[:, c] - m)
    denom = rest + e1

    inv = pl.reciprocal(denom)                # exact; approx=True trades ~1e-3
    p = e1 * inv                              # softmax(x)[:, 1]
    one_m_p = rest * inv
    log_denom = jnp.log(denom)
    log_p = (x[:, 1] - m) - log_denom         # log softmax(x)[:, 1]
    log_1mp = jnp.log(rest) - log_denom       # log(1 - p), cancellation-free

    if float(gamma).is_integer() and gamma >= 0:
        pow_1mp = _int_pow(one_m_p, gamma)
        pow_p = _int_pow(p, gamma)
    else:
        # TODO(synk): non-integer gamma falls back to exp/log pow on the EUP.
        pow_1mp = one_m_p ** gamma
        pow_p = p ** gamma

    # guard 0 * (-inf) -> NaN when p saturates and the term is masked by t
    term_pos = jnp.where(t != 0.0, t * log_p, 0.0)
    term_neg = jnp.where(t != 1.0, (1.0 - t) * log_1mp, 0.0)

    loss = (-alpha) * pow_1mp * term_pos - (1.0 - alpha) * pow_p * term_neg
    out_ref[...] += loss                      # lane-dense VPU accumulate


def focal_loss_pallas(x_nchw, target_nhw, *, gamma=2, alpha=0.5, ts_target=1024):
    """x_nchw: (N, C, H, W) logits. target_nhw: (N, H, W) binary targets."""
    N, C, H, W = x_nchw.shape
    assert C >= 2, "FocalLoss uses the class-1 probability; need C >= 2"
    HW = H * W
    M = N * HW

    ts, n_chunks, inner, r_pad = _plan_spatial(HW, ts_target=ts_target)
    hw_pad = r_pad * 128

    # free reshapes (contiguous NCHW layout kept; no HBM transpose)
    x3 = x_nchw.reshape(N, C, HW)
    t2 = target_nhw.reshape(N, HW)
    if hw_pad != HW:
        # TODO(synk): the pad materializes a copy; an in-kernel tail mask
        # (iota + where on the last block) would avoid it.
        pad = hw_pad - HW
        x3 = jnp.pad(x3, ((0, 0), (0, 0), (0, pad)))
        # padded class-1 logit -> -1e9 so p == 0 exactly and the tail loss is 0
        x3 = x3.at[:, 1, HW:].set(jnp.asarray(-1e9, x3.dtype))
        t2 = jnp.pad(t2, ((0, 0), (0, pad)))
    x4 = x3.reshape(N, C, r_pad, 128)
    t3 = t2.reshape(N, r_pad, 128)

    kernel = functools.partial(_focal_loss_kernel, gamma=gamma, alpha=alpha,
                               num_classes=C)

    partials = pl.pallas_call(
        kernel,
        out_shape=jax.ShapeDtypeStruct((N, n_chunks * ts, 128), jnp.float32),
        grid_spec=pltpu.PrefetchScalarGridSpec(
            num_scalar_prefetch=0,
            grid=(N, n_chunks, inner),
            in_specs=[
                pl.BlockSpec((1, C, ts, 128),
                             lambda n, h, i: (n, 0, h * inner + i, 0)),
                pl.BlockSpec((1, ts, 128),
                             lambda n, h, i: (n, h * inner + i, 0)),
            ],
            out_specs=pl.BlockSpec((1, ts, 128), lambda n, h, i: (n, h, 0)),
        ),
        compiler_params=pltpu.CompilerParams(
            dimension_semantics=("parallel", "parallel", "arbitrary"),
            vmem_limit_bytes=48 * 1024 * 1024),
    )(x4, t3)

    # tiny final reduction + mean outside the kernel (n_chunks*TS*128 f32 per n)
    return jnp.sum(partials) / jnp.float32(M)


def focal_loss_ref(x_nchw, target_nhw, *, gamma=2, alpha=0.5):
    pt = jax.nn.softmax(x_nchw.astype(jnp.float32), axis=1)
    p = pt[:, 1]
    t = target_nhw.astype(jnp.float32)
    loss = (-alpha * (1.0 - p) ** gamma * (t * jnp.log(p))
            - (1.0 - alpha) * p ** gamma * ((1.0 - t) * jnp.log(1.0 - p)))
    return jnp.mean(loss)


if __name__ == "__main__":
    key = jax.random.PRNGKey(0)
    k1, k2 = jax.random.split(key)

    N, C, H, W = 2, 4, 16, 16
    x = jax.random.normal(k1, (N, C, H, W), dtype=jnp.float32)
    target = jax.random.bernoulli(k2, 0.5, (N, H, W)).astype(jnp.float32)

    out = focal_loss_pallas(x, target, gamma=2, alpha=0.5)
    out = jax.block_until_ready(out)

    ref = focal_loss_ref(x, target, gamma=2, alpha=0.5)
    np.testing.assert_allclose(np.asarray(out), np.asarray(ref),
                               rtol=1e-5, atol=1e-5)
    print("KERNEL_OK")
</pallas_src>

<mosaic_0001>
module attributes {stable_mosaic.version = 11 : i64} {
  func.func @_focal_loss_kernel(%arg0: i32, %arg1: i32, %arg2: i32, %arg3: memref<1x4x2x128xf32, #tpu.memory_space<vmem>>, %arg4: memref<1x2x128xf32, #tpu.memory_space<vmem>>, %arg5: memref<1x2x128xf32, #tpu.memory_space<vmem>>) attributes {dimension_semantics = [#tpu.dimension_semantics<parallel>, #tpu.dimension_semantics<parallel>, #tpu.dimension_semantics<arbitrary>], iteration_bounds = array<i64: 2, 1, 1>, scalar_prefetch = 0 : i64, scratch_operands = 0 : i64, tpu.core_type = #tpu.core_type<tc>, window_params = [{transform_indices = @transform_0, window_bounds = array<i64: 1, 4, 2, 128>}, {transform_indices = @transform_1, window_bounds = array<i64: 1, 2, 128>}, {transform_indices = @transform_2, window_bounds = array<i64: 1, 2, 128>}]} {
    %c0_i32 = arith.constant 0 : i32
    %0 = arith.cmpi eq, %arg2, %c0_i32 : i32
    %1 = arith.extui %0 : i1 to i32
    %c0_i32_0 = arith.constant 0 : i32
    %2 = arith.cmpi ne, %1, %c0_i32_0 : i32
    scf.if %2 {
      %cst_19 = arith.constant 0.000000e+00 : f32
      %69 = vector.broadcast %cst_19 : f32 to vector<1x2x128xf32>
      %c0_20 = arith.constant 0 : index
      %c0_21 = arith.constant 0 : index
      %c0_22 = arith.constant 0 : index
      %70 = vector.load %arg5[%c0_20, %c0_21, %c0_22] : memref<1x2x128xf32, #tpu.memory_space<vmem>>, vector<1x2x128xf32>
      tpu.vector_store %arg5[%c0_20, %c0_21, %c0_22], %69 {strides = array<i32>} : memref<1x2x128xf32, #tpu.memory_space<vmem>>, vector<1x2x128xf32>,
    } else {
    }
    %c0 = arith.constant 0 : index
    %c0_1 = arith.constant 0 : index
    %c0_2 = arith.constant 0 : index
    %c0_3 = arith.constant 0 : index
    %3 = vector.load %arg3[%c0, %c0_1, %c0_2, %c0_3] : memref<1x4x2x128xf32, #tpu.memory_space<vmem>>, vector<1x4x2x128xf32>
    %c0_4 = arith.constant 0 : index
    %c0_5 = arith.constant 0 : index
    %c0_6 = arith.constant 0 : index
    %4 = vector.load %arg4[%c0_4, %c0_5, %c0_6] : memref<1x2x128xf32, #tpu.memory_space<vmem>>, vector<1x2x128xf32>
    %5 = vector.extract_strided_slice %3 {offsets = [0, 0, 0, 0], sizes = [1, 1, 2, 128], strides = [1, 1, 1, 1]} : vector<1x4x2x128xf32> to vector<1x1x2x128xf32>
    %6 = vector.shape_cast %5 : vector<1x1x2x128xf32> to vector<1x2x128xf32>
    %7 = vector.extract_strided_slice %3 {offsets = [0, 1, 0, 0], sizes = [1, 1, 2, 128], strides = [1, 1, 1, 1]} : vector<1x4x2x128xf32> to vector<1x1x2x128xf32>
    %8 = vector.shape_cast %7 : vector<1x1x2x128xf32> to vector<1x2x128xf32>
    %9 = arith.maximumf %6, %8 : vector<1x2x128xf32>
    %10 = vector.extract_strided_slice %3 {offsets = [0, 2, 0, 0], sizes = [1, 1, 2, 128], strides = [1, 1, 1, 1]} : vector<1x4x2x128xf32> to vector<1x1x2x128xf32>
    %11 = vector.shape_cast %10 : vector<1x1x2x128xf32> to vector<1x2x128xf32>
    %12 = arith.maximumf %9, %11 : vector<1x2x128xf32>
    %13 = vector.extract_strided_slice %3 {offsets = [0, 3, 0, 0], sizes = [1, 1, 2, 128], strides = [1, 1, 1, 1]} : vector<1x4x2x128xf32> to vector<1x1x2x128xf32>
    %14 = vector.shape_cast %13 : vector<1x1x2x128xf32> to vector<1x2x128xf32>
    %15 = arith.maximumf %12, %14 : vector<1x2x128xf32>
    %16 = vector.extract_strided_slice %3 {offsets = [0, 1, 0, 0], sizes = [1, 1, 2, 128], strides = [1, 1, 1, 1]} : vector<1x4x2x128xf32> to vector<1x1x2x128xf32>
    %17 = vector.shape_cast %16 : vector<1x1x2x128xf32> to vector<1x2x128xf32>
    %18 = arith.subf %17, %15 : vector<1x2x128xf32>
    %19 = math.exp %18 : vector<1x2x128xf32>
    %20 = vector.extract_strided_slice %3 {offsets = [0, 0, 0, 0], sizes = [1, 1, 2, 128], strides = [1, 1, 1, 1]} : vector<1x4x2x128xf32> to vector<1x1x2x128xf32>
    %21 = vector.shape_cast %20 : vector<1x1x2x128xf32> to vector<1x2x128xf32>
    %22 = arith.subf %21, %15 : vector<1x2x128xf32>
    %23 = math.exp %22 : vector<1x2x128xf32>
    %24 = vector.extract_strided_slice %3 {offsets = [0, 2, 0, 0], sizes = [1, 1, 2, 128], strides = [1, 1, 1, 1]} : vector<1x4x2x128xf32> to vector<1x1x2x128xf32>
    %25 = vector.shape_cast %24 : vector<1x1x2x128xf32> to vector<1x2x128xf32>
    %26 = arith.subf %25, %15 : vector<1x2x128xf32>
    %27 = math.exp %26 : vector<1x2x128xf32>
    %28 = arith.addf %23, %27 : vector<1x2x128xf32>
    %29 = vector.extract_strided_slice %3 {offsets = [0, 3, 0, 0], sizes = [1, 1, 2, 128], strides = [1, 1, 1, 1]} : vector<1x4x2x128xf32> to vector<1x1x2x128xf32>
    %30 = vector.shape_cast %29 : vector<1x1x2x128xf32> to vector<1x2x128xf32>
    %31 = arith.subf %30, %15 : vector<1x2x128xf32>
    %32 = math.exp %31 : vector<1x2x128xf32>
    %33 = arith.addf %28, %32 : vector<1x2x128xf32>
    %34 = arith.addf %33, %19 : vector<1x2x128xf32>
    %35 = tpu.reciprocal %34 : vector<1x2x128xf32> -> vector<1x2x128xf32>
    %36 = arith.mulf %19, %35 : vector<1x2x128xf32>
    %37 = arith.mulf %33, %35 : vector<1x2x128xf32>
    %38 = math.log %34 : vector<1x2x128xf32>
    %39 = vector.extract_strided_slice %3 {offsets = [0, 1, 0, 0], sizes = [1, 1, 2, 128], strides = [1, 1, 1, 1]} : vector<1x4x2x128xf32> to vector<1x1x2x128xf32>
    %40 = vector.shape_cast %39 : vector<1x1x2x128xf32> to vector<1x2x128xf32>
    %41 = arith.subf %40, %15 : vector<1x2x128xf32>
    %42 = arith.subf %41, %38 : vector<1x2x128xf32>
    %43 = math.log %33 : vector<1x2x128xf32>
    %44 = arith.subf %43, %38 : vector<1x2x128xf32>
    %45 = arith.mulf %37, %37 : vector<1x2x128xf32>
    %46 = arith.mulf %36, %36 : vector<1x2x128xf32>
    %cst = arith.constant 0.000000e+00 : f32
    %47 = vector.broadcast %cst : f32 to vector<1x2x128xf32>
    %48 = arith.cmpf one, %4, %47 : vector<1x2x128xf32>
    %49 = arith.mulf %4, %42 : vector<1x2x128xf32>
    %cst_7 = arith.constant 0.000000e+00 : f32
    %50 = vector.broadcast %cst_7 : f32 to vector<1x2x128xf32>
    %51 = arith.select %48, %49, %50 : vector<1x2x128xi1>, vector<1x2x128xf32>
    %cst_8 = arith.constant 1.000000e+00 : f32
    %52 = vector.broadcast %cst_8 : f32 to vector<1x2x128xf32>
    %53 = arith.cmpf one, %4, %52 : vector<1x2x128xf32>
    %cst_9 = arith.constant 1.000000e+00 : f32
    %54 = vector.broadcast %cst_9 : f32 to vector<1x2x128xf32>
    %55 = arith.subf %54, %4 : vector<1x2x128xf32>
    %56 = arith.mulf %55, %44 : vector<1x2x128xf32>
    %cst_10 = arith.constant 0.000000e+00 : f32
    %57 = vector.broadcast %cst_10 : f32 to vector<1x2x128xf32>
    %58 = arith.select %53, %56, %57 : vector<1x2x128xi1>, vector<1x2x128xf32>
    %cst_11 = arith.constant -5.000000e-01 : f32
    %59 = vector.broadcast %cst_11 : f32 to vector<1x2x128xf32>
    %60 = arith.mulf %59, %45 : vector<1x2x128xf32>
    %61 = arith.mulf %60, %51 : vector<1x2x128xf32>
    %cst_12 = arith.constant 5.000000e-01 : f32
    %62 = vector.broadcast %cst_12 : f32 to vector<1x2x128xf32>
    %63 = arith.mulf %62, %46 : vector<1x2x128xf32>
    %64 = arith.mulf %63, %58 : vector<1x2x128xf32>
    %65 = arith.subf %61, %64 : vector<1x2x128xf32>
    %c0_13 = arith.constant 0 : index
    %c0_14 = arith.constant 0 : index
    %c0_15 = arith.constant 0 : index
    %66 = vector.load %arg5[%c0_13, %c0_14, %c0_15] : memref<1x2x128xf32, #tpu.memory_space<vmem>>, vector<1x2x128xf32>
    %67 = arith.addf %66, %65 : vector<1x2x128xf32>
    %c0_16 = arith.constant 0 : index
    %c0_17 = arith.constant 0 : index
    %c0_18 = arith.constant 0 : index
    %68 = vector.load %arg5[%c0_16, %c0_17, %c0_18] : memref<1x2x128xf32, #tpu.memory_space<vmem>>, vector<1x2x128xf32>
    tpu.vector_store %arg5[%c0_16, %c0_17, %c0_18], %67 {strides = array<i32>} : memref<1x2x128xf32, #tpu.memory_space<vmem>>, vector<1x2x128xf32>,
    return
  }
  func.func @transform_0(%arg0: i32, %arg1: i32, %arg2: i32) -> (i32, i32, i32, i32) {
    %c1_i32 = arith.constant 1 : i32
    %0 = arith.muli %arg1, %c1_i32 : i32
    %1 = arith.addi %0, %arg2 : i32
    %c0_i32 = arith.constant 0 : i32
    %c0_i32_0 = arith.constant 0 : i32
    %c0_i32_1 = arith.constant 0 : i32
    return %arg0, %c0_i32, %1, %c0_i32_0 : i32, i32, i32, i32
  }
  func.func @transform_1(%arg0: i32, %arg1: i32, %arg2: i32) -> (i32, i32, i32) {
    %c1_i32 = arith.constant 1 : i32
    %0 = arith.muli %arg1, %c1_i32 : i32
    %1 = arith.addi %0, %arg2 : i32
    %c0_i32 = arith.constant 0 : i32
    %c0_i32_0 = arith.constant 0 : i32
    return %arg0, %1, %c0_i32 : i32, i32, i32
  }
  func.func @transform_2(%arg0: i32, %arg1: i32, %arg2: i32) -> (i32, i32, i32) {
    %c0_i32 = arith.constant 0 : i32
    %c0_i32_0 = arith.constant 0 : i32
    return %arg0, %arg1, %c0_i32 : i32, i32, i32
  }
}

</mosaic_0001>

<bundles_post_ra>
// kernel: tpu_custom_call.1
= control target key start
LH: loop header
LB: loop body
LE: loop exit
PB: predicated region body
PF: predicated region fallthrough
CT: control target
= control target key end

     0   :  { %7 = vsyncpa [#allocation3], 0  ;;  %s908_s0 = inlined_call_operand.hbm [shape: f32[2,4,2,128], index: 0, kind: input, shape index: {}]   ;;  %s909_s1 = inlined_call_operand.hbm [shape: f32[2,2,128], index: 1, kind: input, shape index: {}]   ;;  %s910_s2 = inlined_call_operand.hbm [shape: f32[2,2,128], index: 2, kind: output, shape index: {}]  }
   0x1   :  { %9 = vsyncpa [#allocation3 + $0x1], 0 }
   0x2   :  { %10 = vsyncpa [#allocation6], 0 }
   0x3   :  { %12 = vsyncpa [#allocation6 + $0x1], 0 }
   0x4   :  { %13 = vsyncpa [#allocation4], 0 }
   0x5   :  { %15 = vsyncpa [#allocation4 + $0x1], 0  ;;  %s684_s9 = smov 0   ;;  %s686_s10 = smov 0  }
   0x6   :  { %s688_s11 = smov 0   ;;  %s690_s12 = smov 0  }
   0x7   :  { %s692_s13 = smov 0   ;;  %s694_s14 = smov 0  }
   0x8 LB: > { %s413_s15 = sadd.s32 4294967295, %s661_s14   ;;  %s414_s16 = sadd.s32 4294967294, %s661_s14   ;;  %s661_s14 = sphi %s694_s14, %s21_s14   ;;  %s657_s13 = sphi %s692_s13, %s929_s13   ;;  %s653_s12 = sphi %s690_s12, %s928_s12   ;;  %s649_s11 = sphi %s688_s11, %s927_s11   ;;  %s645_s10 = sphi %s686_s10, %s926_s10   ;;  %s641_s9 = sphi %s684_s9, %s925_s9  }
   0x9   : > { %s40_s17 = sadd.s32 1, %s657_s13  ;;  %s51_s18 = sadd.s32 1, %s649_s11 }
   0xa   : > { %p42_p0 = scmp.ge.s32.totalorder %s40_s17, 2  ;;  %p58_p1 = scmp.ne.s32.totalorder %s649_s11, %s645_s10 }
   0xb   : > { %p59_p2 = scmp.eq.s32.totalorder %s661_s14, 0  ;;  %p64_p3 = scmp.ne.s32.totalorder %s645_s10, %s641_s9 }
   0xc   : > { %s931_s17 = smov (%p42_p0, %s40_s17), 0  ;;  %p65_p5 = scmp.eq.s32.totalorder %s413_s15, 0 }
   0xd   : > { %p725_p4 = por %p59_p2, %p58_p1  ;;  %s46_s20 = ssub.s32 %s657_s13, %s931_s17 }
   0xe   : > { %p120_p6 = scmp.eq.s32.totalorder %s413_s15, 1  ;;  %p49_p7 = scmp.eq.s32.totalorder %s46_s20, 0 }
   0xf   : > { %p731_p8 = por %p65_p5, %p64_p3  ;;  %p126_p10 = scmp.eq.s32.totalorder %s414_s16, 1 }
  0x10   : > { %p735_p9 = por %p120_p6, %p58_p1  ;;  %p448_p13 = scmp.lt.s32.totalorder %s661_s14, 2 }
  0x11   : > { %s914_s21 = scalar_select %p731_p8, 1, 0 }
  0x12   : > { %s915_s22 = scalar_select %p735_p9, 1, 0 }
  0x13   : > { %s740_s23 = scalar_select %p49_p7, %s649_s11, %s51_s18  }
  0x14   : > { %p742_p11 = por %p126_p10, %p64_p3  ;;  %s749_s25 = sand.u32 1, %s649_s11  }
  0x15   : > { %s417_s26 = sshll.u32 %s749_s25, 3  ;;  %s430_s27 = sshll.u32 %s657_s13, 7 }
  0x16   : > { %s916_s24 = scalar_select %p742_p11, 1, 0 }
  0x17   : > { %s756_s30 = scalar_lea.hbm %s908_s0, %s430_s27  ;;  %s150_s3 = scalar_lea.vmem [#allocation2], %s417_s26 }
  0x18   : > { %s159_s4 = sshll.u32 %s150_s3, 4  ;;  %p762_p0 = pnand %p448_p13, %p725_p4  ;;  %s758_s4 = int_to_ptr.vmem [resolvable:$true] %s159_s4 }
  0x19   : > { %s147_s6 = scalar_lea.sflag [#allocation3], %s749_s25  ;;  %s515_s7 = scalar_lea.hbm %s756_s30, 128 }
  0x1a   : > { %p516_p2 = scmp.ne.s32.totalorder %s756_s30, %s515_s7  ;;  %p517_p3 = pneg %p762_p0 }
  0x1b   : > { %s520_s16 = scalar_lea.hbm %s908_s0, 256  ;;  %p521_p4 = scmp.lt.u32.totalorder %s756_s30, %s908_s0 }
  0x1c   : > { %p518_p5 = pnand %p517_p3, %p516_p2  ;;  %p522_p7 = scmp.lt.u32.totalorder %s520_s16, %s515_s7 }
  0x1d   : > { %p524_p13 = scmp.lt.u32.totalorder %s515_s7, %s756_s30 }
  0x1e   : > { %p519_p6 = pneg %p518_p5  ;;  %p523_p10 = por %p522_p7, %p521_p4 }
  0x20   : > { %p525_p12 = por %p524_p13, %p523_p10 }
  0x22   : > { %p526_p1 = pnand %p525_p12, %p519_p6 }
  0x24   : > { %529 = shalt.err (!%p526_p1)
}
  0x25   : > { %s530_s20 = scalar_lea.vmem %s758_s4, 128  ;;  %s663_s26 = smov [#allocation2]  }
  0x26   : > { %p531_p2 = scmp.ne.s32.totalorder %s758_s4, %s530_s20  ;;  %s535_s27 = sshll.u32 %s663_s26, 4  ;;  %s536_s27 = int_to_ptr.vmem [resolvable:$false] %s535_s27 }
  0x27   : > { %s537_s28 = scalar_lea.vmem %s536_s27, 256  ;;  %p538_p9 = scmp.lt.s32.totalorder %s758_s4, %s536_s27 }
  0x28   : > { %p533_p5 = pnand %p531_p2, %p517_p3  ;;  %p539_p4 = scmp.lt.s32.totalorder %s537_s28, %s530_s20 }
  0x2a   : > { %p534_p11 = pneg %p533_p5  ;;  %p540_p7 = por %p539_p4, %p538_p9 }
  0x2c   : > { %p541_p10 = pnand %p540_p7, %p534_p11 }
  0x2e   : > { %544 = shalt.err (!%p541_p10)
}
  0x2f   : > { %s664_s29 = smov 32   ;;  %s665_s3 = smov 2  }
  0x30   : > { %440 = dma.hbm_to_vmem [thread:$0]  (!%p762_p0), %s756_s30, 128, %s758_s4, %s147_s6, %s664_s29, %s664_s29, %s665_s3  }
  0x31   : > { %p187_p12 = scmp.lt.s32.totalorder %s661_s14, 3  ;;  %s420_s7 = sshll.u32 %s749_s25, 1 }
  0x32   : > { %s421_s8 = sshll.u32 %s657_s13, 5  ;;  %p918_p9 = scmp.ge.s32.totalorder %s661_s14, 1 }
  0x33   : > { %s807_s19 = scalar_lea.hbm %s909_s1, %s421_s8  ;;  %s173_s20 = scalar_lea.vmem [#allocation5], %s420_s7 }
  0x34   : > { %p800_p11 = pnand %p918_p9, %p187_p12  ;;  %s182_s26 = sshll.u32 %s173_s20, 4  ;;  %s183_s26 = int_to_ptr.vmem [resolvable:$true] %s182_s26 }
  0x35   : > { %s170_s30 = scalar_lea.sflag [#allocation6], %s749_s25  ;;  %s545_s4 = scalar_lea.hbm %s807_s19, 32 }
  0x36   : > { %s919_s15 = scalar_select %p800_p11, 1, 0 }
  0x37   : > { %p546_p1 = scmp.ne.s32.totalorder %s807_s19, %s545_s4  ;;  %s550_s28 = scalar_lea.hbm %s909_s1, 64 }
  0x38   : > { %p551_p2 = scmp.lt.u32.totalorder %s807_s19, %s909_s1  ;;  %p552_p5 = scmp.lt.u32.totalorder %s550_s28, %s545_s4 }
  0x39   : > { %p548_p6 = pnand %p546_p1, %p517_p3  ;;  %p554_p7 = scmp.lt.u32.totalorder %s545_s4, %s807_s19 }
  0x3a   : > { %p553_p4 = por %p552_p5, %p551_p2 }
  0x3b   : > { %p549_p13 = pneg %p548_p6 }
  0x3c   : > { %p555_p10 = por %p554_p7, %p553_p4 }
  0x3e   : > { %p556_p12 = pnand %p555_p10, %p549_p13 }
  0x40   : > { %559 = shalt.err (!%p556_p12)
}
  0x41   : > { %s560_s25 = scalar_lea.vmem %s183_s26, 32  ;;  %s666_s7 = smov [#allocation5]  }
  0x42   : > { %p561_p9 = scmp.ne.s32.totalorder %s183_s26, %s560_s25  ;;  %s565_s8 = sshll.u32 %s666_s7, 4  ;;  %s566_s8 = int_to_ptr.vmem [resolvable:$false] %s565_s8 }
  0x43   : > { %s567_s16 = scalar_lea.vmem %s566_s8, 64  ;;  %p568_p8 = scmp.lt.s32.totalorder %s183_s26, %s566_s8 }
  0x44   : > { %p563_p1 = pnand %p561_p9, %p517_p3  ;;  %p569_p11 = scmp.lt.s32.totalorder %s567_s16, %s560_s25 }
  0x46   : > { %p564_p6 = pneg %p563_p1  ;;  %p570_p2 = por %p569_p11, %p568_p8 }
  0x48   : > { %p571_p5 = pnand %p570_p2, %p564_p6 }
  0x4a   : > { %574 = shalt.err (!%p571_p5)
}
  0x4b   : > { %443 = dma.hbm_to_vmem [thread:$0]  (!%p762_p0), %s807_s19, 32, %s183_s26, %s170_s30  }
  0x4c   : > { %p920_p13 = scmp.ne.s32.totalorder %s919_s15, 0 }
  0x4d   : > { %s832_s18 = sand.u32 (!%p920_p13), 1, %s645_s10   ;;  %p921_p3 = scmp.ne.s32.totalorder (!%p920_p13), %s914_s21, 0 }
  0x4e   : > { %191 = sbr.rel (%p920_p13) target bundleno = 158 (0x9e), region = 28  ;;  %s423_s20 = sshll.u32 (!%p920_p13), %s832_s18, 3 }
  0x4f   : > { %s194_s4 = scalar_lea.sflag (!%p920_p13), [#allocation3], %s832_s18  ;;  %s197_s6 = scalar_lea.vmem (!%p920_p13), [#allocation2], %s423_s20 }
  0x55   : > { %628 = dma.done.wait (%p921_p3), %s194_s4, 128  }
  0x56   : > { %630 = vsyncadd (%p921_p3), %s194_s4, 4294967168  ;;  %s424_s5 = sshll.u32 %s832_s18, 1  ;;  %s203_s15 = scalar_lea.sflag [#allocation6], %s832_s18 }
  0x57   : > { %s842_s19 = scalar_lea.vmem [#allocation5], %s424_s5 }
  0x58   : > { %632 = dma.done.wait (%p921_p3), %s203_s15, 32  }
  0x59   : > { %634 = vsyncadd (%p921_p3), %s203_s15, 4294967264  ;;  %s848_s26 = scalar_lea.vmem [#allocation7], %s424_s5  ;;  %v667_v0 = vmov 0.0   ;;  %v239_v1 = vld [vmem:[%s197_s6] sm:$0x3]  ;;  %s427_s21 = sshll.u32 %s653_s12, 5 }
  0x5a   : > { %238 = vst [vmem:[%s848_s26] sm:$0x3] %v667_v0  ;;  %v240_v2 = vld [vmem:[%s197_s6 + $0x2] sm:$0x3]  ;;  %v241_v3 = vld [vmem:[%s197_s6 + $0x4] sm:$0x3]  ;;  %s303_s30 = sshll.u32 %s848_s26, 4  ;;  %s858_s29 = scalar_lea.hbm %s910_s2, %s427_s21  ;;  %s860_s30 = int_to_ptr.vmem [resolvable:$true] %s303_s30 }
  0x5b   : > { %v244_v4 = vmax.f32 %v239_v1, %v240_v2  ;;  %v242_v5 = vld [vmem:[%s197_s6 + $0x6] sm:$0x3]  ;;  %v243_v24 = vld [vmem:[%s842_s19] sm:$0x3]  ;;  %s289_s3 = scalar_lea.sflag [#allocation4], %s832_s18  ;;  %s575_s25 = scalar_lea.vmem %s860_s30, 32 }
  0x5c   : > { %v277_v31 = vsub.f32 1.0, %v243_v24  ;;  %vm273_vm0 = vcmp.ne.f32.partialorder %v243_v24, 0.0  ;;  %vm276_vm1 = vcmp.ne.f32.partialorder %v243_v24, 1.0  ;;  %p576_p8 = scmp.ne.s32.totalorder %s860_s30, %s575_s25  ;;  %p922_p0 = scmp.ne.s32.totalorder %s915_s22, 0 }
  0x5d   : > { %v245_v6 = vmax.f32 %v244_v4, %v241_v3  ;;  %s668_s12 = smov [#allocation7]  }
  0x5e   : > { %p577_p11 = pnand %p576_p8, %p922_p0  ;;  %s579_s7 = sshll.u32 %s668_s12, 4  ;;  %s580_s7 = int_to_ptr.vmem [resolvable:$false] %s579_s7 }
  0x5f   : > { %v246_v7 = vmax.f32 %v245_v6, %v242_v5  ;;  %s581_s8 = scalar_lea.vmem %s580_s7, 64  ;;  %p582_p7 = scmp.lt.s32.totalorder %s860_s30, %s580_s7 }
  0x60   : > { %p578_p4 = pneg %p577_p11  ;;  %p583_p10 = scmp.lt.s32.totalorder %s581_s8, %s575_s25 }
  0x61   : > { %v247_v8 = vsub.f32 %v240_v2, %v246_v7  ;;  %v250_v9 = vsub.f32 %v239_v1, %v246_v7  ;;  %v253_v10 = vsub.f32 %v241_v3, %v246_v7  ;;  %v257_v11 = vsub.f32 %v242_v5, %v246_v7  ;;  %v285_v44 = vld [vmem:[%s848_s26] sm:$0x3] }
  0x62   : > { %p584_p12 = por %p583_p10, %p582_p7 }
  0x63   : > { %v251_v12 = vmul.f32 1.442695, %v250_v9  ;;  %v254_v13 = vmul.f32 1.442695, %v253_v10  ;;  %v258_v14 = vmul.f32 1.442695, %v257_v11 }
  0x64   : > { %v248_v15 = vmul.f32 1.442695, %v247_v8  ;;  %p585_p9 = pnand %p584_p12, %p578_p4 }
  0x65   : > { %501 = vpow2.f32 %v251_v12 }
  0x66   : > { %503 = vpow2.f32 %v254_v13 }
  0x67   : > { %505 = vpow2.f32 %v258_v14 }
  0x68   : > { %507 = vpow2.f32 %v248_v15 }
  0x6f   : > { %v502_v16 = vpop.eup %501 }
  0x70   : > { %v504_v17 = vpop.eup %503 }
  0x71   : > { %v506_v18 = vpop.eup %505  ;;  %v256_v19 = vadd.f32 %v504_v17, %v502_v16 }
  0x72   : > { %v508_v20 = vpop.eup %507 }
  0x73   : > { %v260_v21 = vadd.f32 %v506_v18, %v256_v19 }
  0x75   : > { %v261_v22 = vadd.f32 %v508_v20, %v260_v21  ;;  %509 = vlog2.f32 %v260_v21 }
  0x77   : > { %511 = vrcp.f32 %v261_v22 }
  0x78   : > { %513 = vlog2.f32 %v261_v22 }
  0x7f   : > { %v510_v23 = vpop.eup %509 }
  0x80   : > { %v269_v26 = vmul.f32 0.6931472, %v510_v23 }
  0x81   : > { %v512_v25 = vpop.eup %511 }
  0x82   : > { %v514_v27 = vpop.eup %513  ;;  %v263_v28 = vmul.f32 %v512_v25, %v508_v20  ;;  %v264_v29 = vmul.f32 %v512_v25, %v260_v21 }
  0x83   : > { %v266_v30 = vmul.f32 0.6931472, %v514_v27 }
  0x84   : > { %v271_v32 = vmul.f32 %v264_v29, %v264_v29  ;;  %v272_v33 = vmul.f32 %v263_v28, %v263_v28 }
  0x85   : > { %v267_v34 = vsub.f32 %v247_v8, %v266_v30  ;;  %v270_v35 = vsub.f32 %v269_v26, %v266_v30 }
  0x86   : > { %v280_v36 = vmul.f32 -0.5, %v271_v32  ;;  %v282_v37 = vmul.f32 0.5, %v272_v33 }
  0x87   : > { %v274_v38 = vmul.f32 %v267_v34, %v243_v24  ;;  %v278_v39 = vmul.f32 %v277_v31, %v270_v35 }
  0x89   : > { %v275_v40 = vsel %vm273_vm0, %v274_v38, 0.0  ;;  %v279_v41 = vsel %vm276_vm1, %v278_v39, 0.0 }
  0x8a   : > { %v281_v42 = vmul.f32 %v280_v36, %v275_v40  ;;  %v283_v43 = vmul.f32 %v282_v37, %v279_v41 }
  0x8c   : > { %v284_v45 = vsub.f32 %v281_v42, %v283_v43 }
  0x8e   : > { %v286_v46 = vadd.f32 %v285_v44, %v284_v45 }
  0x90   : > { %287 = vst [vmem:[%s848_s26] sm:$0x3] %v286_v46 }
  0x91   : > { %588 = shalt.err (!%p585_p9)
}
  0x92   : > { %s589_s16 = scalar_lea.hbm %s858_s29, 32  ;;  %s593_s4 = scalar_lea.hbm %s910_s2, 64 }
  0x93   : > { %p590_p1 = scmp.ne.s32.totalorder %s858_s29, %s589_s16  ;;  %p594_p5 = scmp.lt.u32.totalorder %s858_s29, %s910_s2 }
  0x94   : > { %p595_p13 = scmp.lt.u32.totalorder %s593_s4, %s589_s16  ;;  %p597_p8 = scmp.lt.u32.totalorder %s589_s16, %s858_s29 }
  0x95   : > { %p591_p6 = pnand %p590_p1, %p922_p0 }
  0x96   : > { %p596_p3 = por %p595_p13, %p594_p5 }
  0x97   : > { %p592_p2 = pneg %p591_p6 }
  0x98   : > { %p598_p11 = por %p597_p8, %p596_p3 }
  0x9a   : > { %p599_p4 = pnand %p598_p11, %p592_p2 }
  0x9c   : > { %602 = shalt.err (!%p599_p4)
}
  0x9d   : > { %435 = dma.vmem_to_hbm [thread:$0]  (%p922_p0), %s860_s30, 32, %s858_s29, %s289_s3  }
  0x9e PF: > { %s315_s15 = sand.u32 1, %s641_s9   ;;  %p923_p7 = scmp.ne.s32.totalorder %s916_s24, 0 }
  0x9f   : > { %p924_p10 = scmp.ge.s32.totalorder %s661_s14, 2  ;;  %s316_s19 = scalar_lea.sflag [#allocation4], %s315_s15 }
  0xa1   : > { %p445_p12 = pnand %p924_p10, %p923_p7 }
  0xa3   : > { %636 = dma.done.wait (!%p445_p12), %s316_s19, 32  }
  0xa4   : > { %638 = vsyncadd (!%p445_p12), %s316_s19, 4294967264  ;;  %s21_s14 = sadd.s32 1, %s661_s14   ;;  %s925_s9 = smov %s645_s10 }
  0xa5   : > { %p18_p9 = scmp.ge.s32.totalorder %s21_s14, 4   ;;  %s926_s10 = smov %s649_s11 }
  0xa6   : > { %s927_s11 = smov %s740_s23  ;;  %s928_s12 = smov %s657_s13 }
  0xa7   : > { %s929_s13 = smov %s931_s17  ;;  %20 = sbr.rel (!%p18_p9) target bundleno = 8 (0x8), region = 90 }
  0xae   :  { %321 = vsyncpa [#allocation3], 1 }
  0xaf   :  { %323 = vsyncpa [#allocation3 + $0x1], 1 }
  0xb0   :  { %324 = vsyncpa [#allocation6], 1 }
  0xb1   :  { %326 = vsyncpa [#allocation6 + $0x1], 1 }
  0xb2   :  { %327 = vsyncpa [#allocation4], 1 }
  0xb3   :  { %329 = vsyncpa [#allocation4 + $0x1], 1 }

</bundles_post_ra>
